<compile_context>
chip_gen: v5e
topology: v5e:2x2
jax: 0.10.0
libtpu: 0.0.40
codegen_flags: <defaults>
</compile_context>

<pallas_src>
import jax
import jax.numpy as jnp
from jax.experimental import pallas as pl
from jax.experimental.pallas import tpu as pltpu


def _make_embed_kernel(tb: int, k_inflight: int):
    """Builds the kernel body for one (tb, d_model) output tile.

    Kernel args:
      tok_ref : SMEM scalar-prefetch ref, (n_pad,) int32 token ids.
      w_hbm   : (d_vocab, d_model) embedding table, left in HBM (pl.ANY).
      out_ref : (tb, d_model) VMEM output tile (gather DMAs land here directly).
      sems    : (k_inflight,) DMA semaphores (rolling window of in-flight copies).
    """

    def kernel(tok_ref, w_hbm, out_ref, sems):
        base = pl.program_id(0) * tb

        def start_row(r, tok, slot):
            pltpu.make_async_copy(
                w_hbm.at[pl.ds(tok, 1), :],     # (1, d_model) row in HBM
                out_ref.at[pl.ds(r, 1), :],     # row r of the output tile (VMEM)
                sems.at[slot],
            ).start()

        def wait_row(r, slot):
            # Only the transfer size + semaphore matter for a wait; use a fixed
            # in-bounds source so no SMEM token read happens after the wait.
            pltpu.make_async_copy(
                w_hbm.at[pl.ds(0, 1), :],
                out_ref.at[pl.ds(r, 1), :],
                sems.at[slot],
            ).wait()

        # Prime the rolling window: k_inflight row gathers in flight.
        @pl.loop(0, k_inflight)
        def _prime(r):
            start_row(r, tok_ref[base + r], r)

        # Steady state: wait for row r, then immediately reuse its semaphore
        # slot to launch row r + k_inflight, keeping k_inflight DMAs in flight.
        @pl.loop(0, tb)
        def _gather(r):
            slot = r % k_inflight
            nxt = r + k_inflight
            # Read the next token id BEFORE the wait (DMA waits break SMEM
            # sst->sld forwarding). Clamp keeps the read in-bounds; the value
            # is only used when nxt < tb.
            nxt_tok = tok_ref[base + jnp.minimum(nxt, tb - 1)]

            wait_row(r, slot)

            @pl.when(nxt < tb)
            def _():
                start_row(nxt, nxt_tok, slot)

    return kernel


def embed(tokens: jax.Array, W_E: jax.Array, *,
          max_block_tokens: int = 256, max_inflight: int = 16) -> jax.Array:
    """Pallas equivalent of `W_E[tokens]`.

    tokens: (batch, position) integer array
    W_E:    (d_vocab, d_model) float array
    returns (batch, position, d_model)
    """
    batch, position = tokens.shape
    d_vocab, d_model = W_E.shape
    n = batch * position

    # Tokens per grid step: sublane-dense (multiple of 8), capped for VMEM.
    tb = min(max_block_tokens, ((n + 7) // 8) * 8)
    n_pad = ((n + tb - 1) // tb) * tb
    k = max(1, min(max_inflight, tb))

    # Clamp (matches gather-with-clamp semantics; guarantees in-bounds DMA),
    # flatten, and pad to a whole number of tiles with the valid id 0.
    tok_flat = jnp.clip(tokens.reshape(-1).astype(jnp.int32), 0, d_vocab - 1)
    if n_pad != n:
        tok_flat = jnp.pad(tok_flat, (0, n_pad - n))

    itemsize = jnp.dtype(W_E.dtype).itemsize
    cost = pl.CostEstimate(
        flops=0,
        transcendentals=0,
        bytes_accessed=int(n_pad * d_model * itemsize * 2 + n_pad * 4),
    )

    out_flat = pl.pallas_call(
        _make_embed_kernel(tb, k),
        out_shape=jax.ShapeDtypeStruct((n_pad, d_model), W_E.dtype),
        grid_spec=pltpu.PrefetchScalarGridSpec(
            num_scalar_prefetch=1,            # token ids -> SMEM
            grid=(n_pad // tb,),
            in_specs=[
                pl.BlockSpec(memory_space=pl.ANY),   # W_E stays in HBM
            ],
            out_specs=pl.BlockSpec((tb, d_model), lambda i, tok: (i, 0)),
            scratch_shapes=[
                pltpu.SemaphoreType.DMA((k,)),       # rolling DMA window
            ],
        ),
        compiler_params=pltpu.CompilerParams(
            dimension_semantics=("parallel",),       # disjoint output blocks
        ),
        cost_estimate=cost,
    )(tok_flat, W_E)

    return out_flat[:n].reshape(batch, position, d_model)


if __name__ == "__main__":
    # Small synthetic config consistent with Embed(cfg): d_vocab x d_model table.
    d_vocab = 256
    d_model = 128
    batch = 2
    position = 8
    init_range = 0.02

    key = jax.random.PRNGKey(0)
    k_w, k_tok, k_tok2 = jax.random.split(key, 3)

    # Deterministic parameter init mirroring nn.init.normal_(std=init_range).
    W_E = (jax.random.normal(k_w, (d_vocab, d_model), dtype=jnp.float32)
           * init_range)
    tokens = jax.random.randint(k_tok, (batch, position), 0, d_vocab,
                                dtype=jnp.int32)

    out = embed(tokens, W_E)
    out = jax.block_until_ready(out)

    ref = W_E[tokens]
    assert out.shape == (batch, position, d_model)
    assert out.dtype == jnp.float32
    assert jnp.allclose(out, ref), "Pallas embed mismatch vs reference"

    # Second check: exercises multiple grid steps + tile padding path.
    tokens2 = jax.random.randint(k_tok2, (3, 100), 0, d_vocab, dtype=jnp.int32)
    out2 = jax.block_until_ready(embed(tokens2, W_E))
    assert jnp.allclose(out2, W_E[tokens2]), "Pallas embed mismatch (multi-tile)"

    print("KERNEL_OK")
</pallas_src>

<mosaic_0001>
module attributes {stable_mosaic.version = 11 : i64} {
  func.func @kernel(%arg0: i32, %arg1: memref<16xi32, #tpu.memory_space<smem>>, %arg2: memref<256x128xf32, #tpu.memory_space<any>>, %arg3: memref<16x128xf32, #tpu.memory_space<vmem>>, %arg4: memref<16x!tpu.dma_semaphore, #tpu.memory_space<semaphore_mem>>) attributes {dimension_semantics = [#tpu.dimension_semantics<parallel>], iteration_bounds = array<i64: 1>, scalar_prefetch = 1 : i64, scratch_operands = 1 : i64, tpu.core_type = #tpu.core_type<tc>, window_params = [{}, {transform_indices = @transform_1, window_bounds = array<i64: 16, 128>}]} {
    %c16_i32 = arith.constant 16 : i32
    %0 = arith.muli %arg0, %c16_i32 : i32
    %c0_i32 = arith.constant 0 : i32
    %c16_i32_0 = arith.constant 16 : i32
    %1 = arith.addi %c0_i32, %c16_i32_0 : i32
    %c1_i32 = arith.constant 1 : i32
    scf.for %arg5 = %c0_i32 to %1 step %c1_i32  : i32 {
      %c1_i32_6 = arith.constant 1 : i32
      %3 = arith.muli %arg5, %c1_i32_6 : i32
      %c0_i32_7 = arith.constant 0 : i32
      %4 = arith.addi %c0_i32_7, %3 : i32
      %5 = arith.addi %0, %4 : i32
      %6 = arith.index_cast %5 : i32 to index
      %7 = memref.load %arg1[%6] : memref<16xi32, #tpu.memory_space<smem>>
      %c0_i32_8 = arith.constant 0 : i32
      %8 = tpu.memref_slice %arg2[%7, %c0_i32_8] : memref<256x128xf32, #tpu.memory_space<any>> -> memref<1x128xf32, #tpu.memory_space<any>>
      %c0_i32_9 = arith.constant 0 : i32
      %9 = tpu.memref_slice %arg3[%4, %c0_i32_9] : memref<16x128xf32, #tpu.memory_space<vmem>> -> memref<1x128xf32, #tpu.memory_space<vmem>>
      %10 = tpu.memref_slice %arg4[%4] : memref<16x!tpu.dma_semaphore, #tpu.memory_space<semaphore_mem>> -> memref<1x!tpu.dma_semaphore, #tpu.memory_space<semaphore_mem>>
      %11 = tpu.memref_squeeze %10 : memref<1x!tpu.dma_semaphore, #tpu.memory_space<semaphore_mem>> -> memref<!tpu.dma_semaphore, #tpu.memory_space<semaphore_mem>>
      tpu.enqueue_dma source(%8 : memref<1x128xf32, #tpu.memory_space<any>>) target(%9 : memref<1x128xf32, #tpu.memory_space<vmem>>) target_semaphore(%11 : memref<!tpu.dma_semaphore, #tpu.memory_space<semaphore_mem>>)
    }
    %c16_i32_1 = arith.constant 16 : i32
    %c0_i32_2 = arith.constant 0 : i32
    %c16_i32_3 = arith.constant 16 : i32
    %2 = arith.addi %c0_i32_2, %c16_i32_3 : i32
    %c1_i32_4 = arith.constant 1 : i32
    scf.for %arg5 = %c0_i32_2 to %2 step %c1_i32_4  : i32 {
      %c1_i32_6 = arith.constant 1 : i32
      %3 = arith.muli %arg5, %c1_i32_6 : i32
      %c0_i32_7 = arith.constant 0 : i32
      %4 = arith.addi %c0_i32_7, %3 : i32
      %c16_i32_8 = arith.constant 16 : i32
      %c0_i32_9 = arith.constant 0 : i32
      %5 = arith.cmpi eq, %c16_i32_8, %c0_i32_9 : i32
      %c1_i32_10 = arith.constant 1 : i32
      %6 = arith.select %5, %c1_i32_10, %c16_i32_8 : i32
      %7 = arith.remsi %4, %6 : i32
      %c0_i32_11 = arith.constant 0 : i32
      %8 = arith.cmpi ne, %7, %c0_i32_11 : i32
      %c0_i32_12 = arith.constant 0 : i32
      %9 = arith.cmpi slt, %7, %c0_i32_12 : i32
      %c0_i32_13 = arith.constant 0 : i32
      %10 = arith.cmpi slt, %6, %c0_i32_13 : i32
      %11 = arith.xori %9, %10 : i1
      %12 = arith.andi %11, %8 : i1
      %13 = arith.addi %7, %6 : i32
      %14 = arith.select %12, %13, %7 : i32
      %c16_i32_14 = arith.constant 16 : i32
      %15 = arith.addi %4, %c16_i32_14 : i32
      %c15_i32 = arith.constant 15 : i32
      %16 = arith.minsi %15, %c15_i32 : i32
      %17 = arith.addi %0, %16 : i32
      %18 = arith.index_cast %17 : i32 to index
      %19 = memref.load %arg1[%18] : memref<16xi32, #tpu.memory_space<smem>>
      %c0_i32_15 = arith.constant 0 : i32
      %c0_i32_16 = arith.constant 0 : i32
      %20 = tpu.memref_slice %arg2[%c0_i32_15, %c0_i32_16] : memref<256x128xf32, #tpu.memory_space<any>> -> memref<1x128xf32, #tpu.memory_space<any>>
      %c0_i32_17 = arith.constant 0 : i32
      %21 = tpu.memref_slice %arg3[%4, %c0_i32_17] : memref<16x128xf32, #tpu.memory_space<vmem>> -> memref<1x128xf32, #tpu.memory_space<vmem>>
      %22 = tpu.memref_slice %arg4[%14] : memref<16x!tpu.dma_semaphore, #tpu.memory_space<semaphore_mem>> -> memref<1x!tpu.dma_semaphore, #tpu.memory_space<semaphore_mem>>
      %23 = tpu.memref_squeeze %22 : memref<1x!tpu.dma_semaphore, #tpu.memory_space<semaphore_mem>> -> memref<!tpu.dma_semaphore, #tpu.memory_space<semaphore_mem>>
      tpu.wait_dma2 semaphore(%23 : memref<!tpu.dma_semaphore, #tpu.memory_space<semaphore_mem>>) src(%20 : memref<1x128xf32, #tpu.memory_space<any>>) dst(%21 : memref<1x128xf32, #tpu.memory_space<vmem>>)
      %c16_i32_18 = arith.constant 16 : i32
      %24 = arith.cmpi slt, %15, %c16_i32_18 : i32
      %25 = arith.extui %24 : i1 to i32
      %c0_i32_19 = arith.constant 0 : i32
      %26 = arith.cmpi ne, %25, %c0_i32_19 : i32
      scf.if %26 {
        %c0_i32_20 = arith.constant 0 : i32
        %27 = tpu.memref_slice %arg2[%19, %c0_i32_20] : memref<256x128xf32, #tpu.memory_space<any>> -> memref<1x128xf32, #tpu.memory_space<any>>
        %c0_i32_21 = arith.constant 0 : i32
        %28 = tpu.memref_slice %arg3[%15, %c0_i32_21] : memref<16x128xf32, #tpu.memory_space<vmem>> -> memref<1x128xf32, #tpu.memory_space<vmem>>
        %29 = tpu.memref_slice %arg4[%14] : memref<16x!tpu.dma_semaphore, #tpu.memory_space<semaphore_mem>> -> memref<1x!tpu.dma_semaphore, #tpu.memory_space<semaphore_mem>>
        %30 = tpu.memref_squeeze %29 : memref<1x!tpu.dma_semaphore, #tpu.memory_space<semaphore_mem>> -> memref<!tpu.dma_semaphore, #tpu.memory_space<semaphore_mem>>
        tpu.enqueue_dma source(%27 : memref<1x128xf32, #tpu.memory_space<any>>) target(%28 : memref<1x128xf32, #tpu.memory_space<vmem>>) target_semaphore(%30 : memref<!tpu.dma_semaphore, #tpu.memory_space<semaphore_mem>>)
      } else {
      }
    }
    %c16_i32_5 = arith.constant 16 : i32
    return
  }
  func.func @transform_1(%arg0: i32, %arg1: memref<16xi32, #tpu.memory_space<smem>>) -> (i32, i32) {
    %c0_i32 = arith.constant 0 : i32
    %c0_i32_0 = arith.constant 0 : i32
    return %arg0, %c0_i32 : i32, i32
  }
}

</mosaic_0001>

<bundles_post_ra>
// kernel: tpu_custom_call.1
= control target key start
LH: loop header
LB: loop body
LE: loop exit
PB: predicated region body
PF: predicated region fallthrough
CT: control target
= control target key end

     0   :  { %s386_s12 = smov [#allocation4]   ;;  %s482_s0 = inlined_call_operand.hbm [shape: s32[16], index: 0, kind: input, shape index: {}]   ;;  %s483_s1 = inlined_call_operand.hbm [shape: f32[256,128], index: 1, kind: input, shape index: {}]   ;;  %s484_s2 = inlined_call_operand.hbm [shape: f32[16,128], index: 2, kind: output, shape index: {}]  }
   0x1   :  { %s8_s11 = sshll.u32 %s482_s0, 4  ;;  %s9_s11 = int_to_ptr.hbm [resolvable:$true] %s8_s11 }
   0x2   :  { %11 = dma.hbm_to_smem %s9_s11, 16, %s386_s12, [#allocation3] }
   0x3   :  { %372 = dma.done.wait [#allocation3], 16 }
   0x4   :  { %373 = vsyncadd [#allocation3], 4294967280 }
   0x5   :  { %14 = sfence }
   0x6   :  { %15 = vsyncpa [#allocation6], 0  ;;  %s409_s13 = smov 0  }
   0x7 LB: > { %s24_s14 = sld [smem:[#allocation4 + %s380_s13]]  ;;  %s26_s15 = scalar_lea.vmem [#allocation5], %s380_s13  ;;  %s380_s13 = sphi %s409_s13, %s22_s13  }
   0x8   : > { %s416_s0 = sshll.u32 %s26_s15, 4  ;;  %s27_s20 = scalar_lea.sflag [#allocation2], %s380_s13  ;;  %s38_s0 = int_to_ptr.vmem [resolvable:$true] %s416_s0 }
   0x9   : > { %s292_s25 = scalar_lea.hbm %s483_s1, 256 }
   0xd   : > { %s25_s18 = scalar_lea.hbm %s483_s1, %s24_s14 }
   0xe   : > { %s35_s19 = sshll.u32 %s25_s18, 4  ;;  %s36_s19 = int_to_ptr.hbm [resolvable:$true] %s35_s19 }
   0xf   : > { %s288_s21 = sshra.s32 %s36_s19, 4  ;;  %s289_s21 = int_to_ptr.hbm [resolvable:$true] %s288_s21 }
  0x10   : > { %s290_s22 = scalar_lea.hbm %s289_s21, 1  ;;  %p293_p1 = scmp.lt.s32.totalorder %s289_s21, %s483_s1 }
  0x11   : > { %p291_p0 = scmp.ne.s32.totalorder %s289_s21, %s290_s22  ;;  %p294_p2 = scmp.lt.s32.totalorder %s292_s25, %s290_s22 }
  0x13   : > { %p295_p3 = por %p294_p2, %p293_p1 }
  0x15   : > { %p296_p4 = pnand %p295_p3, %p291_p0 }
  0x17   : > { %299 = shalt.err (!%p296_p4)  }
  0x18   : > { %s300_s30 = sshra.s32 %s38_s0, 4  ;;  %s387_s4 = smov [#allocation5]   ;;  %s301_s30 = int_to_ptr.vmem [resolvable:$true] %s300_s30 }
  0x19   : > { %s302_s3 = scalar_lea.vmem %s301_s30, 1  ;;  %s433_s5 = scalar_lea.vmem %s387_s4, 16 }
  0x1a   : > { %p303_p5 = scmp.ne.s32.totalorder %s301_s30, %s302_s3  ;;  %p305_p6 = scmp.lt.s32.totalorder %s301_s30, [#allocation5] }
  0x1b   : > { %p306_p7 = scmp.lt.s32.totalorder %s433_s5, %s302_s3 }
  0x1d   : > { %p307_p8 = por %p306_p7, %p305_p6 }
  0x1f   : > { %p308_p9 = pnand %p307_p8, %p303_p5 }
  0x21   : > { %311 = shalt.err (!%p308_p9)  }
  0x22   : > { %40 = dma.hbm_to_vmem [thread:$0]  %s36_s19, 16, %s38_s0, %s27_s20 }
  0x23   : > { %s22_s13 = sadd.s32 1, %s380_s13  }
  0x24   : > { %p19_p10 = scmp.ge.s32.totalorder %s22_s13, 16  }
  0x25   :  { %s439_s6 = smov (%p19_p10), 0  }
  0x26   :  { %21 = sbr.rel (!%p19_p10) target bundleno = 7 (0x7), region = 67 }
  0x2b LB: > { %p47_p11 = scmp.lt.s32.totalorder %s384_s6, 0  ;;  %s48_s7 = ssub.s32 0, %s384_s6  ;;  %s384_s6 = sphi %s439_s6, %s46_s6  }
  0x2c   : > { %s233_s8 = smin.u32 %s384_s6, %s48_s7  ;;  %s448_s9 = sadd.s32 16, %s384_s6 }
  0x2d   : > { %s50_s10 = sand.u32 15, %s233_s8   ;;  %p60_p12 = scmp.lt.s32.totalorder %s448_s9, 15 }
  0x2e   : > { %s51_s11 = ssub.s32 0, %s50_s10 }
  0x2f   : > { %s486_s11 = smov (!%p47_p11, %s51_s11), %s50_s10 }
  0x30   : > { %s61_s12 = scalar_select %p60_p12, %s448_s9, 15 }
  0x31   : > { %p235_p13 = scmp.lt.s32.totalorder %s486_s11, 0  ;;  %s57_s13 = sadd.s32 16, %s486_s11 }
  0x32   : > { %s63_s14 = sld [smem:[#allocation4 + %s61_s12]] }
  0x33   : > { %s488_s13 = smov (!%p235_p13, %s57_s13), %s486_s11 }
  0x34   : > { %s452_s15 = scalar_lea.sflag [#allocation2], %s488_s13 }
  0x35   : > { %374 = dma.done.wait %s452_s15, 16 }
  0x36   : > { %375 = vsyncadd %s452_s15, 4294967280  ;;  %p255_p0 = scmp.lt.s32.totalorder %s448_s9, 16  ;;  %s221_s18 = scalar_lea.vmem [#allocation5], %s384_s6 }
  0x37   : > { %s222_s19 = scalar_lea.vmem %s221_s18, 16 [#allocation5] }
  0x38   : > { %s72_s17 = scalar_lea.hbm %s483_s1, %s63_s14  ;;  %s83_s21 = sshll.u32 %s222_s19, 4  ;;  %s84_s21 = int_to_ptr.vmem [resolvable:$true] %s83_s21 }
  0x39   : > { %s81_s20 = sshll.u32 %s72_s17, 4  ;;  %s82_s20 = int_to_ptr.hbm [resolvable:$true] %s81_s20 }
  0x3a   : > { %s312_s22 = sshra.s32 %s82_s20, 4  ;;  %s313_s22 = int_to_ptr.hbm [resolvable:$true] %s312_s22 }
  0x3b   : > { %s314_s23 = scalar_lea.hbm %s313_s22, 1  ;;  %p319_p4 = scmp.lt.s32.totalorder %s313_s22, %s483_s1 }
  0x3c   : > { %p315_p1 = scmp.ne.s32.totalorder %s313_s22, %s314_s23  ;;  %p320_p5 = scmp.lt.s32.totalorder %s292_s25, %s314_s23 }
  0x3e   : > { %p316_p2 = pnand %p315_p1, %p255_p0  ;;  %p321_p6 = por %p320_p5, %p319_p4 }
  0x40   : > { %p317_p3 = pneg %p316_p2 }
  0x42   : > { %p322_p7 = pnand %p321_p6, %p317_p3 }
  0x44   : > { %325 = shalt.err (!%p322_p7)  }
  0x45   : > { %s326_s29 = sshra.s32 %s84_s21, 4  ;;  %s327_s29 = int_to_ptr.vmem [resolvable:$true] %s326_s29 }
  0x46   : > { %s328_s30 = scalar_lea.vmem %s327_s29, 1  ;;  %p333_p11 = scmp.lt.s32.totalorder %s327_s29, [#allocation5] }
  0x47   : > { %p329_p8 = scmp.ne.s32.totalorder %s327_s29, %s328_s30  ;;  %p334_p12 = scmp.lt.s32.totalorder %s433_s5, %s328_s30 }
  0x49   : > { %p330_p9 = pnand %p329_p8, %p255_p0  ;;  %p335_p13 = por %p334_p12, %p333_p11 }
  0x4b   : > { %p331_p10 = pneg %p330_p9 }
  0x4d   : > { %p336_p1 = pnand %p335_p13, %p331_p10 }
  0x4f   : > { %339 = shalt.err (!%p336_p1)  }
  0x50   : > { %254 = dma.hbm_to_vmem [thread:$0]  (%p255_p0), %s82_s20, 16, %s84_s21, %s452_s15 }
  0x51   : > { %s46_s6 = sadd.s32 1, %s384_s6  }
  0x52   : > { %p43_p2 = scmp.ge.s32.totalorder %s46_s6, 16  }
  0x53   :  { %s93_s7 = sshll.u32 (%p43_p2), %s484_s2, 4  ;;  %s388_s8 = smov (%p43_p2), [#allocation5]   ;;  %s94_s7 = int_to_ptr.hbm [resolvable:$true] %s93_s7 }
  0x54   :  { %45 = sbr.rel (!%p43_p2) target bundleno = 43 (0x2b), region = 78  ;;  %s91_s10 = sshll.u32 (%p43_p2), %s388_s8, 4  ;;  %s92_s10 = int_to_ptr.vmem [resolvable:$true] %s91_s10 }
  0x55   :  { %s389_s11 = smov (%p43_p2), 128   ;;  %s390_s12 = smov (%p43_p2), 8  }
  0x56   :  { %99 = dma.vmem_to_hbm [thread:$0]  (%p43_p2), %s92_s10, 256, %s94_s7, [#allocation6], %s389_s11, %s389_s11, %s390_s12  }
  0x59   :  { %376 = dma.done.wait [#allocation6], 256  }
  0x5a   :  { %377 = vsyncadd [#allocation6], 4294967040 }
  0x5b   :  { %104 = vsyncpa [#allocation6], 1 }
  0x5c   :  { %105 = vsyncmov [#allocation2] }
  0x5f   :  { %s106_s9 = vpop.sfrf %105 }
  0x60   :  { %p237_p0 = scmp.ne.s32.totalorder %s106_s9, 0 }
  0x62   :  { %110 = shalt.err (%p237_p0)  }
  0x63   :  { %112 = vsyncmov [#allocation2 + $0x1] }
  0x66   :  { %s113_s6 = vpop.sfrf %112 }
  0x67   :  { %p238_p3 = scmp.ne.s32.totalorder %s113_s6, 0 }
  0x69   :  { %117 = shalt.err (%p238_p3)  }
  0x6a   :  { %119 = vsyncmov [#allocation2 + $0x2] }
  0x6d   :  { %s120_s1 = vpop.sfrf %119 }
  0x6e   :  { %p239_p4 = scmp.ne.s32.totalorder %s120_s1, 0 }
  0x70   :  { %124 = shalt.err (%p239_p4)  }
  0x71   :  { %126 = vsyncmov [#allocation2 + $0x3] }
  0x74   :  { %s127_s2 = vpop.sfrf %126 }
  0x75   :  { %p240_p5 = scmp.ne.s32.totalorder %s127_s2, 0 }
  0x77   :  { %131 = shalt.err (%p240_p5)  }
  0x78   :  { %133 = vsyncmov [#allocation2 + $0x4] }
  0x7b   :  { %s134_s25 = vpop.sfrf %133 }
  0x7c   :  { %p241_p6 = scmp.ne.s32.totalorder %s134_s25, 0 }
  0x7e   :  { %138 = shalt.err (%p241_p6)  }
  0x7f   :  { %140 = vsyncmov [#allocation2 + $0x5] }
  0x82   :  { %s141_s5 = vpop.sfrf %140 }
  0x83   :  { %p242_p7 = scmp.ne.s32.totalorder %s141_s5, 0 }
  0x85   :  { %145 = shalt.err (%p242_p7)  }
  0x86   :  { %147 = vsyncmov [#allocation2 + $0x6] }
  0x89   :  { %s148_s13 = vpop.sfrf %147 }
  0x8a   :  { %p243_p8 = scmp.ne.s32.totalorder %s148_s13, 0 }
  0x8c   :  { %152 = shalt.err (%p243_p8)  }
  0x8d   :  { %154 = vsyncmov [#allocation2 + $0x7] }
  0x90   :  { %s155_s14 = vpop.sfrf %154 }
  0x91   :  { %p244_p9 = scmp.ne.s32.totalorder %s155_s14, 0 }
  0x93   :  { %159 = shalt.err (%p244_p9)  }
  0x94   :  { %161 = vsyncmov [#allocation2 + $0x8] }
  0x97   :  { %s162_s15 = vpop.sfrf %161 }
  0x98   :  { %p245_p10 = scmp.ne.s32.totalorder %s162_s15, 0 }
  0x9a   :  { %166 = shalt.err (%p245_p10)  }
  0x9b   :  { %168 = vsyncmov [#allocation2 + $0x9] }
  0x9e   :  { %s169_s0 = vpop.sfrf %168 }
  0x9f   :  { %p246_p11 = scmp.ne.s32.totalorder %s169_s0, 0 }
  0xa1   :  { %173 = shalt.err (%p246_p11)  }
  0xa2   :  { %175 = vsyncmov [#allocation2 + $0xa] }
  0xa5   :  { %s176_s16 = vpop.sfrf %175 }
  0xa6   :  { %p247_p12 = scmp.ne.s32.totalorder %s176_s16, 0 }
  0xa8   :  { %180 = shalt.err (%p247_p12)  }
  0xa9   :  { %182 = vsyncmov [#allocation2 + $0xb] }
  0xac   :  { %s183_s17 = vpop.sfrf %182 }
  0xad   :  { %p248_p13 = scmp.ne.s32.totalorder %s183_s17, 0 }
  0xaf   :  { %187 = shalt.err (%p248_p13)  }
  0xb0   :  { %189 = vsyncmov [#allocation2 + $0xc] }
  0xb3   :  { %s190_s18 = vpop.sfrf %189 }
  0xb4   :  { %p249_p1 = scmp.ne.s32.totalorder %s190_s18, 0 }
  0xb6   :  { %194 = shalt.err (%p249_p1)  }
  0xb7   :  { %196 = vsyncmov [#allocation2 + $0xd] }
  0xba   :  { %s197_s19 = vpop.sfrf %196 }
  0xbb   :  { %p250_p2 = scmp.ne.s32.totalorder %s197_s19, 0 }
  0xbd   :  { %201 = shalt.err (%p250_p2)  }
  0xbe   :  { %203 = vsyncmov [#allocation2 + $0xe] }
  0xc1   :  { %s204_s20 = vpop.sfrf %203 }
  0xc2   :  { %p251_p0 = scmp.ne.s32.totalorder %s204_s20, 0 }
  0xc4   :  { %208 = shalt.err (%p251_p0)  }
  0xc5   :  { %210 = vsyncmov [#allocation2 + $0xf] }
  0xc8   :  { %s211_s21 = vpop.sfrf %210 }
  0xc9   :  { %p252_p3 = scmp.ne.s32.totalorder %s211_s21, 0 }
  0xcb   :  { %215 = shalt.err (%p252_p3)  }

</bundles_post_ra>
